<compile_context>
chip_gen: v7x
topology: tpu7x:2x2x1
jax: 0.10.0
libtpu: 0.0.40
codegen_flags: <defaults>
</compile_context>

<pallas_src>
import functools

import jax
import jax.numpy as jnp
from jax.experimental import pallas as pl
from jax.experimental.pallas import tpu as pltpu

_LANES = 128                     # lane width of a TPU vreg
_SAMPLES_PER_ROW = _LANES // 2   # 64 interleaved (x0, x1) samples per 128-lane row


# ---------------------------------------------------------------------------
# One-time probe: pin down pltpu.roll's rotation direction on this runtime so
# the adjacent-lane pair-swap is never direction-ambiguous.  Runs one tiny
# kernel per process; falls back to the documented jnp.roll convention.
# ---------------------------------------------------------------------------
_ROLL_IS_NUMPY = None


def _roll_is_numpy_convention() -> bool:
    """True iff pltpu.roll(x, s, axis)[i] == x[(i - s) % n] (jnp.roll semantics)."""
    global _ROLL_IS_NUMPY
    if _ROLL_IS_NUMPY is None:
        try:
            def probe(x_ref, o_ref):
                o_ref[...] = pltpu.roll(x_ref[...], 1, axis=1)

            x = jnp.tile(jnp.arange(_LANES, dtype=jnp.float32), (8, 1))
            out = pl.pallas_call(
                probe, out_shape=jax.ShapeDtypeStruct((8, _LANES), jnp.float32)
            )(x)
            _ROLL_IS_NUMPY = bool(out[0, 1] == 0.0)
        except Exception:  # e.g. called under tracing -> use documented semantics
            _ROLL_IS_NUMPY = True
    return _ROLL_IS_NUMPY


# ---------------------------------------------------------------------------
# Kernel
# ---------------------------------------------------------------------------
def _linreg_softmax_kernel(params_ref, x_ref, o_ref, *, fwd_shift, bwd_shift):
    """Dense, sample-interleaved Linear(2,2)+softmax tile.

    params_ref: (2, 128) f32 VMEM lane patterns:
        row 0: even lanes (w00 - w01), odd lanes -(w10 - w11)
        row 1: even lanes (b0  - b1 ), odd lanes -(b0  - b1 )
    x_ref:  (T, 128) f32 VMEM; native row-major (batch, 2) data viewed as a
            slab: lane 2m holds x0 of a sample, lane 2m+1 its x1.
    o_ref:  (T, 128) f32 VMEM; same interleaving: even lanes p0, odd lanes p1.
    """
    x = x_ref[...]
    gcoef = params_ref[0:1, :]          # (1, 128), broadcast over sublanes
    bcoef = params_ref[1:2, :]

    # Per-lane contribution to the signed logit difference.
    u = x * gcoef

    # Swap each adjacent (even, odd) lane pair: two XLU rotates + one select.
    lane = jax.lax.broadcasted_iota(jnp.int32, (1, _LANES), 1)
    is_even = (lane % 2) == 0
    u_next = pltpu.roll(u, fwd_shift, axis=1)   # u_next[i] = u[i + 1]
    u_prev = pltpu.roll(u, bwd_shift, axis=1)   # u_prev[i] = u[i - 1]
    partner = jnp.where(is_even, u_next, u_prev)

    # d = logit0 - logit1 on even lanes, logit1 - logit0 on odd lanes.
    d = u - partner + bcoef

    # 2-class softmax == sigmoid(d); tanh form is one EUP op, stable both signs.
    o_ref[...] = (0.5 * jnp.tanh(0.5 * d) + 0.5).astype(o_ref.dtype)


# ---------------------------------------------------------------------------
# Wrapper
# ---------------------------------------------------------------------------
def _vmem_limit_bytes() -> int:
    """Generation-aware scoped-VMEM budget (~3/4 of physical, capped)."""
    cap = 64 * 1024 * 1024  # conservative fallback (v7x physical VMEM)
    try:
        cap = int(getattr(pltpu.get_tpu_info(), "vmem_capacity_bytes", cap))
    except Exception:
        pass
    return min(cap * 3 // 4, 100 * 1024 * 1024)  # ~48 MiB v7x, ~96 MiB v5e/v6e


def _choose_tile_rows(rows: int, block_rows: int) -> int:
    block_rows = max(8, (block_rows // 8) * 8)
    if rows <= 8:
        return rows  # single full-extent block (allowed even if not 8-aligned)
    # Guarantee >= 2 grid steps so dimension_semantics=("parallel",) can shard
    # the batch over v7x's two TensorCores.
    half = ((pl.cdiv(rows, 2) + 7) // 8) * 8
    return min(block_rows, half)


def linear_regression_forward(x, w, b, *, block_rows=8192, min_pallas_batch=2048,
                              use_pallas=None):
    """softmax(x @ w + b, axis=-1), specialized for LinearLayer(2, 2).

    x: (batch, 2); w: (2, 2) laid out (dim_in, dim_out); b: (2,) or (1, 2).
    Returns (batch, 2) float32 probabilities.
    """
    x = jnp.asarray(x)
    w = jnp.asarray(w, jnp.float32)
    b = jnp.asarray(b, jnp.float32).reshape(-1)
    batch, din = x.shape
    if din != 2 or w.shape != (2, 2) or b.shape != (2,):
        raise ValueError("kernel is specialized for LinearLayer(2, 2)")

    if use_pallas is None:
        # Small-batch fast path: fixed pallas_call cost dominates below a few
        # thousand samples; XLA's fused elementwise path wins there.
        use_pallas = batch >= min_pallas_batch
    if not use_pallas:
        return jax.nn.softmax(x.astype(jnp.float32) @ w + b[None, :], axis=-1)

    # All in-kernel math in f32 (v5e has no bf16 VPU/EUP); cast once if needed.
    xf = x.astype(jnp.float32)

    # Keep x in its native interleaved (batch, 2) layout; just view it as dense
    # (rows, 128) slabs.  Row-major reshape -> no transpose/relayout pass.
    rows = pl.cdiv(batch, _SAMPLES_PER_ROW)
    pad = rows * _SAMPLES_PER_ROW - batch
    if pad:  # at most 63 samples; zero extra traffic when batch % 64 == 0
        xf = jnp.pad(xf, ((0, pad), (0, 0)))
    x_slab = xf.reshape(rows, _LANES)

    # Fold the 2x2 weights/bias into per-lane coefficients of the signed logit
    # difference (computed once on 2x2 data, outside the kernel).
    lane = jnp.arange(_LANES)
    is_even = (lane % 2) == 0
    gcoef = jnp.where(is_even, w[0, 0] - w[0, 1], -(w[1, 0] - w[1, 1]))
    bcoef = jnp.where(is_even, b[0] - b[1], b[1] - b[0])
    params = jnp.stack([gcoef, bcoef]).astype(jnp.float32)       # (2, 128)

    tile_rows = _choose_tile_rows(rows, block_rows)
    grid = (pl.cdiv(rows, tile_rows),)  # partial last block masked on store

    if _roll_is_numpy_convention():
        fwd_shift, bwd_shift = _LANES - 1, 1   # roll(u, s)[i] = u[i - s]
    else:
        fwd_shift, bwd_shift = 1, _LANES - 1

    kernel = functools.partial(_linreg_softmax_kernel,
                               fwd_shift=fwd_shift, bwd_shift=bwd_shift)

    out_slab = pl.pallas_call(
        kernel,
        out_shape=jax.ShapeDtypeStruct((rows, _LANES), jnp.float32),
        grid=grid,
        in_specs=[
            pl.BlockSpec((2, _LANES), lambda i: (0, 0)),            # params (resident)
            pl.BlockSpec((tile_rows, _LANES), lambda i: (i, 0)),    # x slab
        ],
        out_specs=pl.BlockSpec((tile_rows, _LANES), lambda i: (i, 0)),
        compiler_params=pltpu.CompilerParams(
            dimension_semantics=("parallel",),       # batch blocks independent
            vmem_limit_bytes=_vmem_limit_bytes(),
        ),
    )(params, x_slab)

    probs = out_slab.reshape(rows * _SAMPLES_PER_ROW, 2)
    return probs[:batch] if pad else probs


if __name__ == "__main__":
    key = jax.random.PRNGKey(0)
    kw, kb, k1, k2, k3 = jax.random.split(key, 5)

    DIN, DOUT = 2, 2
    # Mimic the homework LinearLayer init: U(-1/sqrt(DIN), 1/sqrt(DIN)).
    bound = 1.0 / jnp.sqrt(jnp.float32(DIN))
    w = jax.random.uniform(kw, (DIN, DOUT), jnp.float32, minval=-bound, maxval=bound)
    b = jax.random.uniform(kb, (1, DOUT), jnp.float32, minval=-bound, maxval=bound)

    def reference(x):
        return jax.nn.softmax(x @ w + b, axis=-1)

    # 1) Tiny batch forced through the kernel (single partially filled row).
    x_small = jax.random.normal(k1, (8, DIN), jnp.float32)
    out_small = jax.block_until_ready(
        linear_regression_forward(x_small, w, b, use_pallas=True))
    assert out_small.shape == (8, DOUT)
    assert jnp.allclose(out_small, reference(x_small), atol=1e-5)
    assert jnp.allclose(jnp.sum(out_small, axis=-1), 1.0, atol=1e-5)

    # 2) Multi-step grid with a masked partial last block (rows=20, tile=8 ->
    #    grid=(3,)); batch % 64 == 0 so the wrapper does no padding at all.
    x_mid = jax.random.normal(k2, (1280, DIN), jnp.float32)
    out_mid = jax.block_until_ready(
        linear_regression_forward(x_mid, w, b, block_rows=8, use_pallas=True))
    assert jnp.allclose(out_mid, reference(x_mid), atol=1e-5)

    # 3) Default auto path above the small-batch threshold: odd batch (needs
    #    the <=63-sample pad) and two grid steps for the megacore split.
    x_big = jax.random.normal(k3, (4096 + 37, DIN), jnp.float32)
    out_big = jax.block_until_ready(linear_regression_forward(x_big, w, b))
    assert out_big.shape == (4096 + 37, DOUT)
    assert jnp.allclose(out_big, reference(x_big), atol=1e-5)

    # 4) Small-batch fast path (XLA, no Pallas) stays consistent too.
    out_fast = jax.block_until_ready(linear_regression_forward(x_small, w, b))
    assert jnp.allclose(out_fast, reference(x_small), atol=1e-5)

    print("KERNEL_OK")
</pallas_src>

<mosaic_0001>
module attributes {stable_mosaic.version = 11 : i64} {
  func.func @probe(%arg0: memref<8x128xf32, #tpu.memory_space<vmem>>, %arg1: memref<8x128xf32, #tpu.memory_space<vmem>>) attributes {dimension_semantics = [], scalar_prefetch = 0 : i64, scratch_operands = 0 : i64, tpu.core_type = #tpu.core_type<tc>} {
    %c0 = arith.constant 0 : index
    %c0_0 = arith.constant 0 : index
    %0 = vector.load %arg0[%c0, %c0_0] : memref<8x128xf32, #tpu.memory_space<vmem>>, vector<8x128xf32>
    %c1_i32 = arith.constant 1 : i32
    %1 = tpu.dynamic_rotate %0 by %c1_i32 dim 1 : vector<8x128xf32>, i32 -> vector<8x128xf32>
    %c0_1 = arith.constant 0 : index
    %c0_2 = arith.constant 0 : index
    %2 = vector.load %arg1[%c0_1, %c0_2] : memref<8x128xf32, #tpu.memory_space<vmem>>, vector<8x128xf32>
    tpu.vector_store %arg1[%c0_1, %c0_2], %1 {strides = array<i32>} : memref<8x128xf32, #tpu.memory_space<vmem>>, vector<8x128xf32>,
    return
  }
}

module attributes {stable_mosaic.version = 11 : i64} {
  func.func @_linreg_softmax_kernel(%arg0: i32, %arg1: memref<2x128xf32, #tpu.memory_space<vmem>>, %arg2: memref<1x128xf32, #tpu.memory_space<vmem>>, %arg3: memref<1x128xf32, #tpu.memory_space<vmem>>) attributes {dimension_semantics = [#tpu.dimension_semantics<parallel>], iteration_bounds = array<i64: 1>, scalar_prefetch = 0 : i64, scratch_operands = 0 : i64, tpu.core_type = #tpu.core_type<tc>, window_params = [{pipeline_mode = #tpu.pipeline_mode<synchronous>, transform_indices = @transform_0, window_bounds = array<i64: 2, 128>}, {transform_indices = @transform_1, window_bounds = array<i64: 1, 128>}, {transform_indices = @transform_2, window_bounds = array<i64: 1, 128>}]} {
    %c0 = arith.constant 0 : index
    %c0_0 = arith.constant 0 : index
    %0 = vector.load %arg2[%c0, %c0_0] : memref<1x128xf32, #tpu.memory_space<vmem>>, vector<1x128xf32>
    %c0_1 = arith.constant 0 : index
    %c0_2 = arith.constant 0 : index
    %1 = vector.load %arg1[%c0_1, %c0_2] : memref<2x128xf32, #tpu.memory_space<vmem>>, vector<1x128xf32>
    %c1 = arith.constant 1 : index
    %c0_3 = arith.constant 0 : index
    %2 = vector.load %arg1[%c1, %c0_3] : memref<2x128xf32, #tpu.memory_space<vmem>>, vector<1x128xf32>
    %3 = arith.mulf %0, %1 : vector<1x128xf32>
    %4 = tpu.iota {dimensions = array<i32: 1>} : vector<1x128xi32>
    %c2_i32 = arith.constant 2 : i32
    %c0_i32 = arith.constant 0 : i32
    %5 = arith.cmpi eq, %c2_i32, %c0_i32 : i32
    %c1_i32 = arith.constant 1 : i32
    %6 = arith.select %5, %c1_i32, %c2_i32 : i32
    %7 = vector.broadcast %6 : i32 to vector<1x128xi32>
    %8 = arith.remsi %4, %7 : vector<1x128xi32>
    %c0_i32_4 = arith.constant 0 : i32
    %9 = vector.broadcast %c0_i32_4 : i32 to vector<1x128xi32>
    %10 = arith.cmpi ne, %8, %9 : vector<1x128xi32>
    %c0_i32_5 = arith.constant 0 : i32
    %11 = vector.broadcast %c0_i32_5 : i32 to vector<1x128xi32>
    %12 = arith.cmpi slt, %8, %11 : vector<1x128xi32>
    %c0_i32_6 = arith.constant 0 : i32
    %13 = arith.cmpi slt, %6, %c0_i32_6 : i32
    %14 = vector.broadcast %13 : i1 to vector<1x128xi1>
    %15 = vector.broadcast %14 : vector<1x128xi1> to vector<1x128xi1>
    %16 = arith.xori %12, %15 : vector<1x128xi1>
    %17 = arith.andi %16, %10 : vector<1x128xi1>
    %18 = vector.broadcast %6 : i32 to vector<1x128xi32>
    %19 = arith.addi %8, %18 : vector<1x128xi32>
    %20 = arith.select %17, %19, %8 : vector<1x128xi1>, vector<1x128xi32>
    %c0_i32_7 = arith.constant 0 : i32
    %21 = vector.broadcast %c0_i32_7 : i32 to vector<1x128xi32>
    %22 = arith.cmpi eq, %20, %21 : vector<1x128xi32>
    %c127_i32 = arith.constant 127 : i32
    %23 = tpu.dynamic_rotate %3 by %c127_i32 dim 1 : vector<1x128xf32>, i32 -> vector<1x128xf32>
    %c1_i32_8 = arith.constant 1 : i32
    %24 = tpu.dynamic_rotate %3 by %c1_i32_8 dim 1 : vector<1x128xf32>, i32 -> vector<1x128xf32>
    %25 = arith.select %22, %23, %24 : vector<1x128xi1>, vector<1x128xf32>
    %26 = arith.subf %3, %25 : vector<1x128xf32>
    %27 = arith.addf %26, %2 : vector<1x128xf32>
    %cst = arith.constant 5.000000e-01 : f32
    %28 = vector.broadcast %cst : f32 to vector<1x128xf32>
    %29 = arith.mulf %28, %27 : vector<1x128xf32>
    %30 = math.tanh %29 : vector<1x128xf32>
    %cst_9 = arith.constant 5.000000e-01 : f32
    %31 = vector.broadcast %cst_9 : f32 to vector<1x128xf32>
    %32 = arith.mulf %31, %30 : vector<1x128xf32>
    %cst_10 = arith.constant 5.000000e-01 : f32
    %33 = vector.broadcast %cst_10 : f32 to vector<1x128xf32>
    %34 = arith.addf %32, %33 : vector<1x128xf32>
    %c0_11 = arith.constant 0 : index
    %c0_12 = arith.constant 0 : index
    %35 = vector.load %arg3[%c0_11, %c0_12] : memref<1x128xf32, #tpu.memory_space<vmem>>, vector<1x128xf32>
    tpu.vector_store %arg3[%c0_11, %c0_12], %34 {strides = array<i32>} : memref<1x128xf32, #tpu.memory_space<vmem>>, vector<1x128xf32>,
    return
  }
  func.func @transform_0(%arg0: i32) -> (i32, i32) {
    %c0_i32 = arith.constant 0 : i32
    %c0_i32_0 = arith.constant 0 : i32
    %c0_i32_1 = arith.constant 0 : i32
    return %c0_i32, %c0_i32_0 : i32, i32
  }
  func.func @transform_1(%arg0: i32) -> (i32, i32) {
    %c0_i32 = arith.constant 0 : i32
    %c0_i32_0 = arith.constant 0 : i32
    return %arg0, %c0_i32 : i32, i32
  }
  func.func @transform_2(%arg0: i32) -> (i32, i32) {
    %c0_i32 = arith.constant 0 : i32
    %c0_i32_0 = arith.constant 0 : i32
    return %arg0, %c0_i32 : i32, i32
  }
}

</mosaic_0001>

<bundles_post_ra>
// kernel: tpu_custom_call.1
= control target key start
LH: loop header
LB: loop body
LE: loop exit
PB: predicated region body
PF: predicated region fallthrough
CT: control target
= control target key end

     0   :  { %6 = vsyncpa [#allocation3], 0  ;;  %s128_s0 = inlined_call_operand.hbm [shape: f32[8,128], index: 0, kind: input, shape index: {}]   ;;  %s129_s1 = inlined_call_operand.hbm [shape: f32[8,128], index: 1, kind: output, shape index: {}]  }
   0x1   :  { %7 = vsyncpa [#allocation4], 0  ;;  %s91_s6 = smov [#allocation2]   ;;  %s43_s10 = scalar_lea.hbm %s128_s0, 128 }
   0x2   :  { %s14_s7 = sshll.u32 %s91_s6, 4  ;;  %p44_p0 = scmp.ne.s32.totalorder %s128_s0, %s43_s10  ;;  %s15_s7 = int_to_ptr.vmem [resolvable:$true] %s14_s7 }
   0x3   :  { %p47_p1 = scmp.lt.u32.totalorder %s43_s10, %s128_s0 }
   0x5   :  { %p49_p2 = pnand %p47_p1, %p44_p0 }
   0x7   :  { %52 = shalt.err (!%p49_p2)
}
   0x8   :  { %s53_s15 = scalar_lea.vmem %s15_s7, 128  ;;  %p58_p4 = scmp.lt.s32.totalorder %s15_s7, %s15_s7 }
   0x9   :  { %p54_p3 = scmp.ne.s32.totalorder %s15_s7, %s53_s15  ;;  %p59_p5 = scmp.lt.s32.totalorder %s53_s15, %s53_s15 }
   0xb   :  { %p60_p6 = por %p59_p5, %p58_p4 }
   0xd   :  { %p61_p7 = pnand %p60_p6, %p54_p3 }
   0xf   :  { %64 = shalt.err (!%p61_p7)
}
  0x10   :  { %17 = dma.hbm_to_vmem [thread:$0]  %s128_s0, 128, %s15_s7, [#allocation3]  }
  0x11   :  { %87 = dma.done.wait [#allocation3], 128  }
  0x12   :  { %88 = vsyncadd [#allocation3], 4294967168  ;;  %v21_v0 = vld [vmem:[#allocation2] sm:$0xff]  ;;  %s92_s18 = smov 1   ;;  %s93_s19 = smov [#allocation5]  }
  0x13   :  { %22 = vrot.lane.b32.xlu0 %v21_v0, %s92_s18  ;;  %s31_s20 = sshll.u32 %s93_s19, 4  ;;  %s32_s20 = int_to_ptr.vmem [resolvable:$true] %s31_s20 }
  0x14   :  { %s65_s21 = scalar_lea.vmem %s32_s20, 128  ;;  %p70_p9 = scmp.lt.s32.totalorder %s32_s20, %s32_s20 }
  0x15   :  { %p66_p8 = scmp.ne.s32.totalorder %s32_s20, %s65_s21  ;;  %p71_p10 = scmp.lt.s32.totalorder %s65_s21, %s65_s21 }
  0x17   :  { %p72_p11 = por %p71_p10, %p70_p9 }
  0x19   :  { %p73_p12 = pnand %p72_p11, %p66_p8 }
  0x85   :  { %v23_v1 = vpop.permute.xlu0 %22 }
  0x86   :  { %24 = vst [vmem:[#allocation5] sm:$0xff] %v23_v1 }
  0x87   :  { %76 = shalt.err (!%p73_p12)
}
  0x88   :  { %s77_s0 = scalar_lea.hbm %s129_s1, 128 }
  0x89   :  { %p78_p13 = scmp.ne.s32.totalorder %s129_s1, %s77_s0  ;;  %p81_p0 = scmp.lt.u32.totalorder %s77_s0, %s129_s1 }
  0x8b   :  { %p83_p1 = pnand %p81_p0, %p78_p13 }
  0x8d   :  { %86 = shalt.err (!%p83_p1)
}
  0x8e   :  { %34 = dma.vmem_to_hbm [thread:$0]  %s32_s20, 128, %s129_s1, [#allocation4]  }
  0x8f   :  { %89 = dma.done.wait [#allocation4], 128  }
  0x90   :  { %90 = vsyncadd [#allocation4], 4294967168 }
  0x91   :  { %38 = vsyncpa [#allocation3], 1 }
  0x92   :  { %39 = vsyncpa [#allocation4], 1 }

// kernel: tpu_custom_call.1
= control target key start
LH: loop header
LB: loop body
LE: loop exit
PB: predicated region body
PF: predicated region fallthrough
CT: control target
= control target key end

     0   :  { %7 = vsyncpa [#allocation3], 0  ;;  %s170_s0 = inlined_call_operand.hbm [shape: f32[2,128], index: 0, kind: input, shape index: {}]   ;;  %s171_s1 = inlined_call_operand.vmem [shape: f32[1,128], index: 1, kind: input, shape index: {}]   ;;  %s172_s2 = inlined_call_operand.hbm [shape: f32[1,128], index: 2, kind: output, shape index: {}]  }
   0x1   :  { %8 = vsyncpa [#allocation4], 0  ;;  %s124_s9 = smov [#allocation2]   ;;  %s76_s13 = scalar_lea.hbm %s170_s0, 32 }
   0x2   :  { %s15_s10 = sshll.u32 %s124_s9, 4  ;;  %p77_p0 = scmp.ne.s32.totalorder %s170_s0, %s76_s13  ;;  %s16_s10 = int_to_ptr.vmem [resolvable:$true] %s15_s10 }
   0x3   :  { %p80_p1 = scmp.lt.u32.totalorder %s76_s13, %s170_s0 }
   0x5   :  { %p82_p2 = pnand %p80_p1, %p77_p0 }
   0x7   :  { %85 = shalt.err (!%p82_p2)
}
   0x8   :  { %s86_s18 = scalar_lea.vmem %s16_s10, 32  ;;  %p91_p4 = scmp.lt.s32.totalorder %s16_s10, %s16_s10 }
   0x9   :  { %p87_p3 = scmp.ne.s32.totalorder %s16_s10, %s86_s18  ;;  %p92_p5 = scmp.lt.s32.totalorder %s86_s18, %s86_s18 }
   0xb   :  { %p93_p6 = por %p92_p5, %p91_p4 }
   0xd   :  { %p94_p7 = pnand %p93_p6, %p87_p3 }
   0xf   :  { %97 = shalt.err (!%p94_p7)
}
  0x10   :  { %18 = dma.hbm_to_vmem [thread:$0]  %s170_s0, 32, %s16_s10, [#allocation3]  }
  0x11   :  { %120 = dma.done.wait [#allocation3], 32  }
  0x12   :  { %121 = vsyncadd [#allocation3], 4294967264  ;;  %v24_v0 = vld [vmem:[%s171_s1] sm:$0x1]  ;;  %s125_s23 = smov 127   ;;  %s126_s24 = smov 1   ;;  %v28_v3 = vlaneseq }
  0x13   :  { %v25_v1 = vld [vmem:[#allocation2] sm:$0x1]  ;;  %v26_v8 = vld [vmem:[#allocation2 + $0x1] sm:$0x1]  ;;  %s127_s0 = smov [#allocation5]  }
  0x14   :  { %v27_v2 = vmul.f32 %v25_v1, %v24_v0  ;;  %v29_v4 = vand.u32 127, %v28_v3  ;;  %s61_s1 = sshll.u32 %s127_s0, 4  ;;  %s62_s1 = int_to_ptr.vmem [resolvable:$true] %s61_s1 }
  0x15   :  { %s98_s25 = scalar_lea.vmem %s62_s1, 16  ;;  %s102_s26 = scalar_lea.vmem %s62_s1, 32 }
  0x16   :  { %43 = vrot.lane.b32.xlu0 %v27_v2, %s125_s23  ;;  %v34_v5 = vand.u32 1, %v29_v4  ;;  %p99_p8 = scmp.ne.s32.totalorder %s62_s1, %s98_s25  ;;  %p103_p9 = scmp.lt.s32.totalorder %s62_s1, %s62_s1 }
  0x17   :  { %p104_p10 = scmp.lt.s32.totalorder %s102_s26, %s98_s25 }
  0x18   :  { %vm42_vm0 = vcmp.eq.s32.totalorder %v34_v5, 0 }
  0x19   :  { %p105_p11 = por %p104_p10, %p103_p9 }
  0x1a   :  { %45 = vrot.lane.b32.xlu0 %v27_v2, %s126_s24 }
  0x1b   :  { %p106_p12 = pnand %p105_p11, %p99_p8 }
  0x88   :  { %v44_v6 = vpop.permute.xlu0 %43 }
  0x8c   :  { %v46_v7 = vpop.permute.xlu0 %45 }
  0x8d   :  { %v47_v9 = vsel %vm42_vm0, %v44_v6, %v46_v7 }
  0x8e   :  { %v48_v10 = vsub.f32 %v27_v2, %v47_v9 }
  0x90   :  { %v49_v11 = vadd.f32 %v48_v10, %v26_v8 }
  0x92   :  { %v50_v12 = vmul.f32 0.5, %v49_v11 }
  0x94   :  { %74 = vtanh.f32 %v50_v12 }
  0x9e   :  { %v75_v13 = vpop.eup %74 }
  0x9f   :  { %v52_v14 = vmul.f32 0.5, %v75_v13 }
  0xa1   :  { %v53_v15 = vadd.f32 0.5, %v52_v14 }
  0xa3   :  { %54 = vst [vmem:[#allocation5] sm:$0x1] %v53_v15 }
  0xa4   :  { %109 = shalt.err (!%p106_p12)
}
  0xa5   :  { %s110_s29 = scalar_lea.hbm %s172_s2, 16 }
  0xa6   :  { %p111_p13 = scmp.ne.s32.totalorder %s172_s2, %s110_s29  ;;  %p114_p0 = scmp.lt.u32.totalorder %s110_s29, %s172_s2 }
  0xa8   :  { %p116_p1 = pnand %p114_p0, %p111_p13 }
  0xaa   :  { %119 = shalt.err (!%p116_p1)
}
  0xab   :  { %64 = dma.vmem_to_hbm [thread:$0]  %s62_s1, 16, %s172_s2, [#allocation4]  }
  0xac   :  { %122 = dma.done.wait [#allocation4], 16  }
  0xad   :  { %123 = vsyncadd [#allocation4], 4294967280 }
  0xae   :  { %68 = vsyncpa [#allocation3], 1 }
  0xaf   :  { %69 = vsyncpa [#allocation4], 1 }

</bundles_post_ra>
